<compile_context>
chip_gen: v5e
topology: v5e:2x2
jax: 0.10.0
libtpu: 0.0.40
codegen_flags: <defaults>
</compile_context>

<pallas_src>
import functools
import math

import jax
import jax.numpy as jnp
import numpy as np
from jax.experimental import pallas as pl
from jax.experimental.pallas import tpu as pltpu


# ----------------------------------------------------------------------------
# Host-side B-spline basis table (mirrors `basisF` / `ele_spline` in the spec).
# Recursive Cox-de Boor evaluation; runs once in NumPy at setup time.
# ----------------------------------------------------------------------------
def basisF(u, k, i, t):
    if k == 0:
        return 1.0 if t[i] <= u < t[i + 1] else 0.0
    if t[i + k] == t[i]:
        s1 = 0.0
    else:
        s1 = (u - t[i]) / (t[i + k] - t[i]) * basisF(u, k - 1, i, t)
    if t[i + k + 1] == t[i + 1]:
        s2 = 0.0
    else:
        s2 = (t[i + k + 1] - u) / (t[i + k + 1] - t[i + 1]) * basisF(u, k - 1, i + 1, t)
    return s1 + s2


def build_ele_spline(spline_k, spline_n, int_T):
    tt = np.append(np.arange(0, int_T, int_T / (spline_k + spline_n)), [int_T])
    return np.array(
        [[basisF(u, spline_k, i, tt) for i in range(spline_n)]
         for u in np.arange(0, 4, 0.001)],
        dtype=np.float32)                                   # (4000, n)


# ----------------------------------------------------------------------------
# Fused kernel: spline-weight evaluation + 3x3 pad-1 conv (per image).
# ----------------------------------------------------------------------------
_PAD = 128  # lane-aligned on-chip padding; must be >= W + 1


def _spline_conv_kernel(basis_ref, c1_ref, x_ref, o_ref, *, H, W):
    """basis_ref: SMEM (n,) f32            B-spline basis values at time t
       c1_ref:    VMEM (n, Cout, 9*Cin)    spline coeffs, col r = (ky*3+kx)*Cin + ci
       x_ref:     VMEM (1, Cin, H*W)       one image, channels on sublanes, pixels on lanes
       o_ref:     VMEM (1, Cout, H*W)
    """
    n, Cout, _ = c1_ref.shape
    _, Cin, HW = x_ref.shape

    # ---- evaluate the spline weights:  w(t) = sum_i basis_i(t) * c1[..., i]  (VPU) ----
    w_mat = basis_ref[0] * c1_ref[0].astype(jnp.float32)          # (Cout, 9*Cin)
    for i in range(1, n):
        w_mat = w_mat + basis_ref[i] * c1_ref[i].astype(jnp.float32)

    # ---- zero-pad the flattened image on-chip (128-aligned concat, stays in VMEM) ----
    x = x_ref[0].astype(jnp.float32)                              # (Cin, HW), lane-dense
    zeros = jnp.zeros((Cin, _PAD), jnp.float32)
    xpad = jnp.concatenate([zeros, x, zeros], axis=1)             # (Cin, HW + 2*_PAD)

    # column masks: horizontal taps of the flat layout wrap across image rows
    col = jax.lax.broadcasted_iota(jnp.int32, (1, HW), 1) % W
    not_left = col != 0          # invalid when the tap would read x[y, -1]
    not_right = col != (W - 1)   # invalid when the tap would read x[y, W]

    # ---- 3x3 conv as 9 lane-shifted taps x Cin VPU outer-product MACs (no MXU) ----
    acc = jnp.zeros((Cout, HW), jnp.float32)
    for dy in range(3):
        for dx in range(3):
            shift = (dy - 1) * W + (dx - 1)
            tap = xpad[:, _PAD + shift:_PAD + shift + HW]         # (Cin, HW)
            if dx == 0:
                tap = jnp.where(not_left, tap, 0.0)
            elif dx == 2:
                tap = jnp.where(not_right, tap, 0.0)
            base = (dy * 3 + dx) * Cin
            for ci in range(Cin):
                w_col = w_mat[:, base + ci:base + ci + 1]         # (Cout, 1)
                acc = acc + w_col * tap[ci:ci + 1, :]             # (Cout, HW) broadcast FMA

    o_ref[0] = acc.astype(o_ref.dtype)                            # lane-dense store


# ----------------------------------------------------------------------------
# Wrapper: PyTorch-style NCHW in / NCHW out.
# ----------------------------------------------------------------------------
def spline_linear_forward(t, x, c1, basis_table):
    """SplineLinear.forward(t, x). x: (N, C, H, W); c1: (C, C, 3, 3, n)."""
    N, Cin, H, W = x.shape
    Cout, _, _, _, n = c1.shape
    HW = H * W
    assert W + 1 <= _PAD, "demo sizing assumption (W + 1 must fit the on-chip pad)"

    # basis values at time t (mirrors ele_spline[round(t / 0.001)]) — tiny XLA gather
    t_idx = jnp.round(jnp.asarray(t, jnp.float32) / 0.001).astype(jnp.int32)
    basis = jax.lax.dynamic_index_in_dim(basis_table, t_idx, axis=0, keepdims=False)  # (n,)

    # (Cout, Cin, 3, 3, n) -> (n, Cout, 9*Cin), column index r = (ky*3 + kx)*Cin + ci
    c1_r = jnp.transpose(c1, (4, 0, 2, 3, 1)).reshape(n, Cout, 9 * Cin)

    # NCHW flattened: channels on sublanes, pixels on lanes (metadata-only reshape)
    x_flat = x.reshape(N, Cin, HW)

    kernel = functools.partial(_spline_conv_kernel, H=H, W=W)
    out_flat = pl.pallas_call(
        kernel,
        out_shape=jax.ShapeDtypeStruct((N, Cout, HW), x.dtype),
        grid=(N,),
        in_specs=[
            pl.BlockSpec(memory_space=pltpu.MemorySpace.SMEM),        # basis (n,) scalars
            pl.BlockSpec((n, Cout, 9 * Cin), lambda b: (0, 0, 0)),    # c1_r (resident)
            pl.BlockSpec((1, Cin, HW), lambda b: (b, 0, 0)),          # x, one image / step
        ],
        out_specs=pl.BlockSpec((1, Cout, HW), lambda b: (b, 0, 0)),
        compiler_params=pltpu.CompilerParams(dimension_semantics=("parallel",)),
    )(basis, c1_r, x_flat)

    return out_flat.reshape(N, Cout, H, W)


# ----------------------------------------------------------------------------
if __name__ == "__main__":
    # Spline configuration (argparse-driven in the original; fixed small values here).
    spline_n, spline_k, int_T = 3, 2, 4.0
    basis_table_np = build_ele_spline(spline_k, spline_n, int_T)      # (4000, 3)
    basis_table = jnp.asarray(basis_table_np)

    key = jax.random.PRNGKey(0)
    k_x, k_c = jax.random.split(key)
    N, dim, H, W = 2, 4, 16, 16
    x = jax.random.normal(k_x, (N, dim, H, W), jnp.float32)

    # kaiming_uniform_(a=sqrt(3))-style init for c1 (dim, dim, 3, 3, n)
    fan_in = dim * 3 * 3 * spline_n
    bound = math.sqrt(6.0 / ((1.0 + 3.0) * fan_in))
    c1 = jax.random.uniform(k_c, (dim, dim, 3, 3, spline_n), jnp.float32,
                            minval=-bound, maxval=bound)

    t = jnp.float32(1.234)

    out = jax.jit(spline_linear_forward)(t, x, c1, basis_table)
    out = jax.block_until_ready(out)
    assert out.shape == (N, dim, H, W)

    # ---- pure-JAX/NumPy reference (same semantics as the PyTorch module) ----
    t_idx = int(jnp.round(t / 0.001))
    basis_np = basis_table_np[t_idx]                                  # (n,)
    w_ref = jnp.asarray(np.einsum("oihwn,n->oihw", np.asarray(c1), basis_np))
    ref = jax.lax.conv_general_dilated(
        x, w_ref, window_strides=(1, 1), padding=((1, 1), (1, 1)),
        dimension_numbers=("NCHW", "OIHW", "NCHW"),
        precision=jax.lax.Precision.HIGHEST)
    np.testing.assert_allclose(np.asarray(out), np.asarray(ref), atol=1e-4, rtol=1e-4)

    print("KERNEL_OK")
</pallas_src>

<mosaic_0001>
module attributes {stable_mosaic.version = 11 : i64} {
  func.func @_spline_conv_kernel(%arg0: i32, %arg1: memref<3xf32, #tpu.memory_space<smem>>, %arg2: memref<3x4x36xf32, #tpu.memory_space<vmem>>, %arg3: memref<1x4x256xf32, #tpu.memory_space<vmem>>, %arg4: memref<1x4x256xf32, #tpu.memory_space<vmem>>) attributes {dimension_semantics = [#tpu.dimension_semantics<parallel>], iteration_bounds = array<i64: 2>, scalar_prefetch = 0 : i64, scratch_operands = 0 : i64, tpu.core_type = #tpu.core_type<tc>, window_params = [{transform_indices = @transform_0, window_bounds = array<i64: 3>}, {pipeline_mode = #tpu.pipeline_mode<synchronous>, transform_indices = @transform_1, window_bounds = array<i64: 3, 4, 36>}, {transform_indices = @transform_2, window_bounds = array<i64: 1, 4, 256>}, {transform_indices = @transform_3, window_bounds = array<i64: 1, 4, 256>}]} {
    %c0 = arith.constant 0 : index
    %0 = memref.load %arg1[%c0] : memref<3xf32, #tpu.memory_space<smem>>
    %c0_0 = arith.constant 0 : index
    %c0_1 = arith.constant 0 : index
    %c0_2 = arith.constant 0 : index
    %1 = vector.load %arg2[%c0_0, %c0_1, %c0_2] : memref<3x4x36xf32, #tpu.memory_space<vmem>>, vector<1x4x36xf32>
    %2 = vector.shape_cast %1 : vector<1x4x36xf32> to vector<4x36xf32>
    %3 = vector.broadcast %0 : f32 to vector<4x36xf32>
    %4 = arith.mulf %3, %2 : vector<4x36xf32>
    %c1 = arith.constant 1 : index
    %5 = memref.load %arg1[%c1] : memref<3xf32, #tpu.memory_space<smem>>
    %c1_3 = arith.constant 1 : index
    %c0_4 = arith.constant 0 : index
    %c0_5 = arith.constant 0 : index
    %6 = vector.load %arg2[%c1_3, %c0_4, %c0_5] : memref<3x4x36xf32, #tpu.memory_space<vmem>>, vector<1x4x36xf32>
    %7 = vector.shape_cast %6 : vector<1x4x36xf32> to vector<4x36xf32>
    %8 = vector.broadcast %5 : f32 to vector<4x36xf32>
    %9 = arith.mulf %8, %7 : vector<4x36xf32>
    %10 = arith.addf %4, %9 : vector<4x36xf32>
    %c2 = arith.constant 2 : index
    %11 = memref.load %arg1[%c2] : memref<3xf32, #tpu.memory_space<smem>>
    %c2_6 = arith.constant 2 : index
    %c0_7 = arith.constant 0 : index
    %c0_8 = arith.constant 0 : index
    %12 = vector.load %arg2[%c2_6, %c0_7, %c0_8] : memref<3x4x36xf32, #tpu.memory_space<vmem>>, vector<1x4x36xf32>
    %13 = vector.shape_cast %12 : vector<1x4x36xf32> to vector<4x36xf32>
    %14 = vector.broadcast %11 : f32 to vector<4x36xf32>
    %15 = arith.mulf %14, %13 : vector<4x36xf32>
    %16 = arith.addf %10, %15 : vector<4x36xf32>
    %c0_9 = arith.constant 0 : index
    %c0_10 = arith.constant 0 : index
    %c0_11 = arith.constant 0 : index
    %17 = vector.load %arg3[%c0_9, %c0_10, %c0_11] : memref<1x4x256xf32, #tpu.memory_space<vmem>>, vector<1x4x256xf32>
    %18 = vector.shape_cast %17 : vector<1x4x256xf32> to vector<4x256xf32>
    %cst = arith.constant 0.000000e+00 : f32
    %19 = vector.broadcast %cst : f32 to vector<4x128xf32>
    %20 = tpu.concatenate %19, %18, %19 in 1 : vector<4x128xf32>, vector<4x256xf32>, vector<4x128xf32> -> vector<4x512xf32>
    %21 = tpu.iota {dimensions = array<i32: 1>} : vector<1x256xi32>
    %c16_i32 = arith.constant 16 : i32
    %c0_i32 = arith.constant 0 : i32
    %22 = arith.cmpi eq, %c16_i32, %c0_i32 : i32
    %c1_i32 = arith.constant 1 : i32
    %23 = arith.select %22, %c1_i32, %c16_i32 : i32
    %24 = vector.broadcast %23 : i32 to vector<1x256xi32>
    %25 = arith.remsi %21, %24 : vector<1x256xi32>
    %c0_i32_12 = arith.constant 0 : i32
    %26 = vector.broadcast %c0_i32_12 : i32 to vector<1x256xi32>
    %27 = arith.cmpi ne, %25, %26 : vector<1x256xi32>
    %c0_i32_13 = arith.constant 0 : i32
    %28 = vector.broadcast %c0_i32_13 : i32 to vector<1x256xi32>
    %29 = arith.cmpi slt, %25, %28 : vector<1x256xi32>
    %c0_i32_14 = arith.constant 0 : i32
    %30 = arith.cmpi slt, %23, %c0_i32_14 : i32
    %31 = vector.broadcast %30 : i1 to vector<1x256xi1>
    %32 = vector.broadcast %31 : vector<1x256xi1> to vector<1x256xi1>
    %33 = arith.xori %29, %32 : vector<1x256xi1>
    %34 = arith.andi %33, %27 : vector<1x256xi1>
    %35 = vector.broadcast %23 : i32 to vector<1x256xi32>
    %36 = arith.addi %25, %35 : vector<1x256xi32>
    %37 = arith.select %34, %36, %25 : vector<1x256xi1>, vector<1x256xi32>
    %c0_i32_15 = arith.constant 0 : i32
    %38 = vector.broadcast %c0_i32_15 : i32 to vector<1x256xi32>
    %39 = arith.cmpi ne, %37, %38 : vector<1x256xi32>
    %c15_i32 = arith.constant 15 : i32
    %40 = vector.broadcast %c15_i32 : i32 to vector<1x256xi32>
    %41 = arith.cmpi ne, %37, %40 : vector<1x256xi32>
    %cst_16 = arith.constant 0.000000e+00 : f32
    %42 = vector.broadcast %cst_16 : f32 to vector<4x256xf32>
    %43 = vector.extract_strided_slice %20 {offsets = [0, 111], sizes = [4, 256], strides = [1, 1]} : vector<4x512xf32> to vector<4x256xf32>
    %cst_17 = arith.constant 0.000000e+00 : f32
    %44 = vector.shape_cast %39 : vector<1x256xi1> to vector<1x256xi1>
    %45 = vector.broadcast %44 : vector<1x256xi1> to vector<4x256xi1>
    %46 = vector.broadcast %cst_17 : f32 to vector<4x256xf32>
    %47 = arith.select %45, %43, %46 : vector<4x256xi1>, vector<4x256xf32>
    %48 = vector.extract_strided_slice %16 {offsets = [0, 0], sizes = [4, 1], strides = [1, 1]} : vector<4x36xf32> to vector<4x1xf32>
    %49 = vector.extract_strided_slice %47 {offsets = [0, 0], sizes = [1, 256], strides = [1, 1]} : vector<4x256xf32> to vector<1x256xf32>
    %50 = vector.broadcast %48 : vector<4x1xf32> to vector<4x256xf32>
    %51 = vector.broadcast %49 : vector<1x256xf32> to vector<4x256xf32>
    %52 = arith.mulf %50, %51 : vector<4x256xf32>
    %53 = arith.addf %42, %52 : vector<4x256xf32>
    %54 = vector.extract_strided_slice %16 {offsets = [0, 1], sizes = [4, 1], strides = [1, 1]} : vector<4x36xf32> to vector<4x1xf32>
    %55 = vector.extract_strided_slice %47 {offsets = [1, 0], sizes = [1, 256], strides = [1, 1]} : vector<4x256xf32> to vector<1x256xf32>
    %56 = vector.broadcast %54 : vector<4x1xf32> to vector<4x256xf32>
    %57 = vector.broadcast %55 : vector<1x256xf32> to vector<4x256xf32>
    %58 = arith.mulf %56, %57 : vector<4x256xf32>
    %59 = arith.addf %53, %58 : vector<4x256xf32>
    %60 = vector.extract_strided_slice %16 {offsets = [0, 2], sizes = [4, 1], strides = [1, 1]} : vector<4x36xf32> to vector<4x1xf32>
    %61 = vector.extract_strided_slice %47 {offsets = [2, 0], sizes = [1, 256], strides = [1, 1]} : vector<4x256xf32> to vector<1x256xf32>
    %62 = vector.broadcast %60 : vector<4x1xf32> to vector<4x256xf32>
    %63 = vector.broadcast %61 : vector<1x256xf32> to vector<4x256xf32>
    %64 = arith.mulf %62, %63 : vector<4x256xf32>
    %65 = arith.addf %59, %64 : vector<4x256xf32>
    %66 = vector.extract_strided_slice %16 {offsets = [0, 3], sizes = [4, 1], strides = [1, 1]} : vector<4x36xf32> to vector<4x1xf32>
    %67 = vector.extract_strided_slice %47 {offsets = [3, 0], sizes = [1, 256], strides = [1, 1]} : vector<4x256xf32> to vector<1x256xf32>
    %68 = vector.broadcast %66 : vector<4x1xf32> to vector<4x256xf32>
    %69 = vector.broadcast %67 : vector<1x256xf32> to vector<4x256xf32>
    %70 = arith.mulf %68, %69 : vector<4x256xf32>
    %71 = arith.addf %65, %70 : vector<4x256xf32>
    %72 = vector.extract_strided_slice %20 {offsets = [0, 112], sizes = [4, 256], strides = [1, 1]} : vector<4x512xf32> to vector<4x256xf32>
    %73 = vector.extract_strided_slice %16 {offsets = [0, 4], sizes = [4, 1], strides = [1, 1]} : vector<4x36xf32> to vector<4x1xf32>
    %74 = vector.extract_strided_slice %72 {offsets = [0, 0], sizes = [1, 256], strides = [1, 1]} : vector<4x256xf32> to vector<1x256xf32>
    %75 = vector.broadcast %73 : vector<4x1xf32> to vector<4x256xf32>
    %76 = vector.broadcast %74 : vector<1x256xf32> to vector<4x256xf32>
    %77 = arith.mulf %75, %76 : vector<4x256xf32>
    %78 = arith.addf %71, %77 : vector<4x256xf32>
    %79 = vector.extract_strided_slice %16 {offsets = [0, 5], sizes = [4, 1], strides = [1, 1]} : vector<4x36xf32> to vector<4x1xf32>
    %80 = vector.extract_strided_slice %72 {offsets = [1, 0], sizes = [1, 256], strides = [1, 1]} : vector<4x256xf32> to vector<1x256xf32>
    %81 = vector.broadcast %79 : vector<4x1xf32> to vector<4x256xf32>
    %82 = vector.broadcast %80 : vector<1x256xf32> to vector<4x256xf32>
    %83 = arith.mulf %81, %82 : vector<4x256xf32>
    %84 = arith.addf %78, %83 : vector<4x256xf32>
    %85 = vector.extract_strided_slice %16 {offsets = [0, 6], sizes = [4, 1], strides = [1, 1]} : vector<4x36xf32> to vector<4x1xf32>
    %86 = vector.extract_strided_slice %72 {offsets = [2, 0], sizes = [1, 256], strides = [1, 1]} : vector<4x256xf32> to vector<1x256xf32>
    %87 = vector.broadcast %85 : vector<4x1xf32> to vector<4x256xf32>
    %88 = vector.broadcast %86 : vector<1x256xf32> to vector<4x256xf32>
    %89 = arith.mulf %87, %88 : vector<4x256xf32>
    %90 = arith.addf %84, %89 : vector<4x256xf32>
    %91 = vector.extract_strided_slice %16 {offsets = [0, 7], sizes = [4, 1], strides = [1, 1]} : vector<4x36xf32> to vector<4x1xf32>
    %92 = vector.extract_strided_slice %72 {offsets = [3, 0], sizes = [1, 256], strides = [1, 1]} : vector<4x256xf32> to vector<1x256xf32>
    %93 = vector.broadcast %91 : vector<4x1xf32> to vector<4x256xf32>
    %94 = vector.broadcast %92 : vector<1x256xf32> to vector<4x256xf32>
    %95 = arith.mulf %93, %94 : vector<4x256xf32>
    %96 = arith.addf %90, %95 : vector<4x256xf32>
    %97 = vector.extract_strided_slice %20 {offsets = [0, 113], sizes = [4, 256], strides = [1, 1]} : vector<4x512xf32> to vector<4x256xf32>
    %cst_18 = arith.constant 0.000000e+00 : f32
    %98 = vector.shape_cast %41 : vector<1x256xi1> to vector<1x256xi1>
    %99 = vector.broadcast %98 : vector<1x256xi1> to vector<4x256xi1>
    %100 = vector.broadcast %cst_18 : f32 to vector<4x256xf32>
    %101 = arith.select %99, %97, %100 : vector<4x256xi1>, vector<4x256xf32>
    %102 = vector.extract_strided_slice %16 {offsets = [0, 8], sizes = [4, 1], strides = [1, 1]} : vector<4x36xf32> to vector<4x1xf32>
    %103 = vector.extract_strided_slice %101 {offsets = [0, 0], sizes = [1, 256], strides = [1, 1]} : vector<4x256xf32> to vector<1x256xf32>
    %104 = vector.broadcast %102 : vector<4x1xf32> to vector<4x256xf32>
    %105 = vector.broadcast %103 : vector<1x256xf32> to vector<4x256xf32>
    %106 = arith.mulf %104, %105 : vector<4x256xf32>
    %107 = arith.addf %96, %106 : vector<4x256xf32>
    %108 = vector.extract_strided_slice %16 {offsets = [0, 9], sizes = [4, 1], strides = [1, 1]} : vector<4x36xf32> to vector<4x1xf32>
    %109 = vector.extract_strided_slice %101 {offsets = [1, 0], sizes = [1, 256], strides = [1, 1]} : vector<4x256xf32> to vector<1x256xf32>
    %110 = vector.broadcast %108 : vector<4x1xf32> to vector<4x256xf32>
    %111 = vector.broadcast %109 : vector<1x256xf32> to vector<4x256xf32>
    %112 = arith.mulf %110, %111 : vector<4x256xf32>
    %113 = arith.addf %107, %112 : vector<4x256xf32>
    %114 = vector.extract_strided_slice %16 {offsets = [0, 10], sizes = [4, 1], strides = [1, 1]} : vector<4x36xf32> to vector<4x1xf32>
    %115 = vector.extract_strided_slice %101 {offsets = [2, 0], sizes = [1, 256], strides = [1, 1]} : vector<4x256xf32> to vector<1x256xf32>
    %116 = vector.broadcast %114 : vector<4x1xf32> to vector<4x256xf32>
    %117 = vector.broadcast %115 : vector<1x256xf32> to vector<4x256xf32>
    %118 = arith.mulf %116, %117 : vector<4x256xf32>
    %119 = arith.addf %113, %118 : vector<4x256xf32>
    %120 = vector.extract_strided_slice %16 {offsets = [0, 11], sizes = [4, 1], strides = [1, 1]} : vector<4x36xf32> to vector<4x1xf32>
    %121 = vector.extract_strided_slice %101 {offsets = [3, 0], sizes = [1, 256], strides = [1, 1]} : vector<4x256xf32> to vector<1x256xf32>
    %122 = vector.broadcast %120 : vector<4x1xf32> to vector<4x256xf32>
    %123 = vector.broadcast %121 : vector<1x256xf32> to vector<4x256xf32>
    %124 = arith.mulf %122, %123 : vector<4x256xf32>
    %125 = arith.addf %119, %124 : vector<4x256xf32>
    %126 = vector.extract_strided_slice %20 {offsets = [0, 127], sizes = [4, 256], strides = [1, 1]} : vector<4x512xf32> to vector<4x256xf32>
    %cst_19 = arith.constant 0.000000e+00 : f32
    %127 = vector.shape_cast %39 : vector<1x256xi1> to vector<1x256xi1>
    %128 = vector.broadcast %127 : vector<1x256xi1> to vector<4x256xi1>
    %129 = vector.broadcast %cst_19 : f32 to vector<4x256xf32>
    %130 = arith.select %128, %126, %129 : vector<4x256xi1>, vector<4x256xf32>
    %131 = vector.extract_strided_slice %16 {offsets = [0, 12], sizes = [4, 1], strides = [1, 1]} : vector<4x36xf32> to vector<4x1xf32>
    %132 = vector.extract_strided_slice %130 {offsets = [0, 0], sizes = [1, 256], strides = [1, 1]} : vector<4x256xf32> to vector<1x256xf32>
    %133 = vector.broadcast %131 : vector<4x1xf32> to vector<4x256xf32>
    %134 = vector.broadcast %132 : vector<1x256xf32> to vector<4x256xf32>
    %135 = arith.mulf %133, %134 : vector<4x256xf32>
    %136 = arith.addf %125, %135 : vector<4x256xf32>
    %137 = vector.extract_strided_slice %16 {offsets = [0, 13], sizes = [4, 1], strides = [1, 1]} : vector<4x36xf32> to vector<4x1xf32>
    %138 = vector.extract_strided_slice %130 {offsets = [1, 0], sizes = [1, 256], strides = [1, 1]} : vector<4x256xf32> to vector<1x256xf32>
    %139 = vector.broadcast %137 : vector<4x1xf32> to vector<4x256xf32>
    %140 = vector.broadcast %138 : vector<1x256xf32> to vector<4x256xf32>
    %141 = arith.mulf %139, %140 : vector<4x256xf32>
    %142 = arith.addf %136, %141 : vector<4x256xf32>
    %143 = vector.extract_strided_slice %16 {offsets = [0, 14], sizes = [4, 1], strides = [1, 1]} : vector<4x36xf32> to vector<4x1xf32>
    %144 = vector.extract_strided_slice %130 {offsets = [2, 0], sizes = [1, 256], strides = [1, 1]} : vector<4x256xf32> to vector<1x256xf32>
    %145 = vector.broadcast %143 : vector<4x1xf32> to vector<4x256xf32>
    %146 = vector.broadcast %144 : vector<1x256xf32> to vector<4x256xf32>
    %147 = arith.mulf %145, %146 : vector<4x256xf32>
    %148 = arith.addf %142, %147 : vector<4x256xf32>
    %149 = vector.extract_strided_slice %16 {offsets = [0, 15], sizes = [4, 1], strides = [1, 1]} : vector<4x36xf32> to vector<4x1xf32>
    %150 = vector.extract_strided_slice %130 {offsets = [3, 0], sizes = [1, 256], strides = [1, 1]} : vector<4x256xf32> to vector<1x256xf32>
    %151 = vector.broadcast %149 : vector<4x1xf32> to vector<4x256xf32>
    %152 = vector.broadcast %150 : vector<1x256xf32> to vector<4x256xf32>
    %153 = arith.mulf %151, %152 : vector<4x256xf32>
    %154 = arith.addf %148, %153 : vector<4x256xf32>
    %155 = vector.extract_strided_slice %20 {offsets = [0, 128], sizes = [4, 256], strides = [1, 1]} : vector<4x512xf32> to vector<4x256xf32>
    %156 = vector.extract_strided_slice %16 {offsets = [0, 16], sizes = [4, 1], strides = [1, 1]} : vector<4x36xf32> to vector<4x1xf32>
    %157 = vector.extract_strided_slice %155 {offsets = [0, 0], sizes = [1, 256], strides = [1, 1]} : vector<4x256xf32> to vector<1x256xf32>
    %158 = vector.broadcast %156 : vector<4x1xf32> to vector<4x256xf32>
    %159 = vector.broadcast %157 : vector<1x256xf32> to vector<4x256xf32>
    %160 = arith.mulf %158, %159 : vector<4x256xf32>
    %161 = arith.addf %154, %160 : vector<4x256xf32>
    %162 = vector.extract_strided_slice %16 {offsets = [0, 17], sizes = [4, 1], strides = [1, 1]} : vector<4x36xf32> to vector<4x1xf32>
    %163 = vector.extract_strided_slice %155 {offsets = [1, 0], sizes = [1, 256], strides = [1, 1]} : vector<4x256xf32> to vector<1x256xf32>
    %164 = vector.broadcast %162 : vector<4x1xf32> to vector<4x256xf32>
    %165 = vector.broadcast %163 : vector<1x256xf32> to vector<4x256xf32>
    %166 = arith.mulf %164, %165 : vector<4x256xf32>
    %167 = arith.addf %161, %166 : vector<4x256xf32>
    %168 = vector.extract_strided_slice %16 {offsets = [0, 18], sizes = [4, 1], strides = [1, 1]} : vector<4x36xf32> to vector<4x1xf32>
    %169 = vector.extract_strided_slice %155 {offsets = [2, 0], sizes = [1, 256], strides = [1, 1]} : vector<4x256xf32> to vector<1x256xf32>
    %170 = vector.broadcast %168 : vector<4x1xf32> to vector<4x256xf32>
    %171 = vector.broadcast %169 : vector<1x256xf32> to vector<4x256xf32>
    %172 = arith.mulf %170, %171 : vector<4x256xf32>
    %173 = arith.addf %167, %172 : vector<4x256xf32>
    %174 = vector.extract_strided_slice %16 {offsets = [0, 19], sizes = [4, 1], strides = [1, 1]} : vector<4x36xf32> to vector<4x1xf32>
    %175 = vector.extract_strided_slice %155 {offsets = [3, 0], sizes = [1, 256], strides = [1, 1]} : vector<4x256xf32> to vector<1x256xf32>
    %176 = vector.broadcast %174 : vector<4x1xf32> to vector<4x256xf32>
    %177 = vector.broadcast %175 : vector<1x256xf32> to vector<4x256xf32>
    %178 = arith.mulf %176, %177 : vector<4x256xf32>
    %179 = arith.addf %173, %178 : vector<4x256xf32>
    %180 = vector.extract_strided_slice %20 {offsets = [0, 129], sizes = [4, 256], strides = [1, 1]} : vector<4x512xf32> to vector<4x256xf32>
    %cst_20 = arith.constant 0.000000e+00 : f32
    %181 = vector.shape_cast %41 : vector<1x256xi1> to vector<1x256xi1>
    %182 = vector.broadcast %181 : vector<1x256xi1> to vector<4x256xi1>
    %183 = vector.broadcast %cst_20 : f32 to vector<4x256xf32>
    %184 = arith.select %182, %180, %183 : vector<4x256xi1>, vector<4x256xf32>
    %185 = vector.extract_strided_slice %16 {offsets = [0, 20], sizes = [4, 1], strides = [1, 1]} : vector<4x36xf32> to vector<4x1xf32>
    %186 = vector.extract_strided_slice %184 {offsets = [0, 0], sizes = [1, 256], strides = [1, 1]} : vector<4x256xf32> to vector<1x256xf32>
    %187 = vector.broadcast %185 : vector<4x1xf32> to vector<4x256xf32>
    %188 = vector.broadcast %186 : vector<1x256xf32> to vector<4x256xf32>
    %189 = arith.mulf %187, %188 : vector<4x256xf32>
    %190 = arith.addf %179, %189 : vector<4x256xf32>
    %191 = vector.extract_strided_slice %16 {offsets = [0, 21], sizes = [4, 1], strides = [1, 1]} : vector<4x36xf32> to vector<4x1xf32>
    %192 = vector.extract_strided_slice %184 {offsets = [1, 0], sizes = [1, 256], strides = [1, 1]} : vector<4x256xf32> to vector<1x256xf32>
    %193 = vector.broadcast %191 : vector<4x1xf32> to vector<4x256xf32>
    %194 = vector.broadcast %192 : vector<1x256xf32> to vector<4x256xf32>
    %195 = arith.mulf %193, %194 : vector<4x256xf32>
    %196 = arith.addf %190, %195 : vector<4x256xf32>
    %197 = vector.extract_strided_slice %16 {offsets = [0, 22], sizes = [4, 1], strides = [1, 1]} : vector<4x36xf32> to vector<4x1xf32>
    %198 = vector.extract_strided_slice %184 {offsets = [2, 0], sizes = [1, 256], strides = [1, 1]} : vector<4x256xf32> to vector<1x256xf32>
    %199 = vector.broadcast %197 : vector<4x1xf32> to vector<4x256xf32>
    %200 = vector.broadcast %198 : vector<1x256xf32> to vector<4x256xf32>
    %201 = arith.mulf %199, %200 : vector<4x256xf32>
    %202 = arith.addf %196, %201 : vector<4x256xf32>
    %203 = vector.extract_strided_slice %16 {offsets = [0, 23], sizes = [4, 1], strides = [1, 1]} : vector<4x36xf32> to vector<4x1xf32>
    %204 = vector.extract_strided_slice %184 {offsets = [3, 0], sizes = [1, 256], strides = [1, 1]} : vector<4x256xf32> to vector<1x256xf32>
    %205 = vector.broadcast %203 : vector<4x1xf32> to vector<4x256xf32>
    %206 = vector.broadcast %204 : vector<1x256xf32> to vector<4x256xf32>
    %207 = arith.mulf %205, %206 : vector<4x256xf32>
    %208 = arith.addf %202, %207 : vector<4x256xf32>
    %209 = vector.extract_strided_slice %20 {offsets = [0, 143], sizes = [4, 256], strides = [1, 1]} : vector<4x512xf32> to vector<4x256xf32>
    %cst_21 = arith.constant 0.000000e+00 : f32
    %210 = vector.shape_cast %39 : vector<1x256xi1> to vector<1x256xi1>
    %211 = vector.broadcast %210 : vector<1x256xi1> to vector<4x256xi1>
    %212 = vector.broadcast %cst_21 : f32 to vector<4x256xf32>
    %213 = arith.select %211, %209, %212 : vector<4x256xi1>, vector<4x256xf32>
    %214 = vector.extract_strided_slice %16 {offsets = [0, 24], sizes = [4, 1], strides = [1, 1]} : vector<4x36xf32> to vector<4x1xf32>
    %215 = vector.extract_strided_slice %213 {offsets = [0, 0], sizes = [1, 256], strides = [1, 1]} : vector<4x256xf32> to vector<1x256xf32>
    %216 = vector.broadcast %214 : vector<4x1xf32> to vector<4x256xf32>
    %217 = vector.broadcast %215 : vector<1x256xf32> to vector<4x256xf32>
    %218 = arith.mulf %216, %217 : vector<4x256xf32>
    %219 = arith.addf %208, %218 : vector<4x256xf32>
    %220 = vector.extract_strided_slice %16 {offsets = [0, 25], sizes = [4, 1], strides = [1, 1]} : vector<4x36xf32> to vector<4x1xf32>
    %221 = vector.extract_strided_slice %213 {offsets = [1, 0], sizes = [1, 256], strides = [1, 1]} : vector<4x256xf32> to vector<1x256xf32>
    %222 = vector.broadcast %220 : vector<4x1xf32> to vector<4x256xf32>
    %223 = vector.broadcast %221 : vector<1x256xf32> to vector<4x256xf32>
    %224 = arith.mulf %222, %223 : vector<4x256xf32>
    %225 = arith.addf %219, %224 : vector<4x256xf32>
    %226 = vector.extract_strided_slice %16 {offsets = [0, 26], sizes = [4, 1], strides = [1, 1]} : vector<4x36xf32> to vector<4x1xf32>
    %227 = vector.extract_strided_slice %213 {offsets = [2, 0], sizes = [1, 256], strides = [1, 1]} : vector<4x256xf32> to vector<1x256xf32>
    %228 = vector.broadcast %226 : vector<4x1xf32> to vector<4x256xf32>
    %229 = vector.broadcast %227 : vector<1x256xf32> to vector<4x256xf32>
    %230 = arith.mulf %228, %229 : vector<4x256xf32>
    %231 = arith.addf %225, %230 : vector<4x256xf32>
    %232 = vector.extract_strided_slice %16 {offsets = [0, 27], sizes = [4, 1], strides = [1, 1]} : vector<4x36xf32> to vector<4x1xf32>
    %233 = vector.extract_strided_slice %213 {offsets = [3, 0], sizes = [1, 256], strides = [1, 1]} : vector<4x256xf32> to vector<1x256xf32>
    %234 = vector.broadcast %232 : vector<4x1xf32> to vector<4x256xf32>
    %235 = vector.broadcast %233 : vector<1x256xf32> to vector<4x256xf32>
    %236 = arith.mulf %234, %235 : vector<4x256xf32>
    %237 = arith.addf %231, %236 : vector<4x256xf32>
    %238 = vector.extract_strided_slice %20 {offsets = [0, 144], sizes = [4, 256], strides = [1, 1]} : vector<4x512xf32> to vector<4x256xf32>
    %239 = vector.extract_strided_slice %16 {offsets = [0, 28], sizes = [4, 1], strides = [1, 1]} : vector<4x36xf32> to vector<4x1xf32>
    %240 = vector.extract_strided_slice %238 {offsets = [0, 0], sizes = [1, 256], strides = [1, 1]} : vector<4x256xf32> to vector<1x256xf32>
    %241 = vector.broadcast %239 : vector<4x1xf32> to vector<4x256xf32>
    %242 = vector.broadcast %240 : vector<1x256xf32> to vector<4x256xf32>
    %243 = arith.mulf %241, %242 : vector<4x256xf32>
    %244 = arith.addf %237, %243 : vector<4x256xf32>
    %245 = vector.extract_strided_slice %16 {offsets = [0, 29], sizes = [4, 1], strides = [1, 1]} : vector<4x36xf32> to vector<4x1xf32>
    %246 = vector.extract_strided_slice %238 {offsets = [1, 0], sizes = [1, 256], strides = [1, 1]} : vector<4x256xf32> to vector<1x256xf32>
    %247 = vector.broadcast %245 : vector<4x1xf32> to vector<4x256xf32>
    %248 = vector.broadcast %246 : vector<1x256xf32> to vector<4x256xf32>
    %249 = arith.mulf %247, %248 : vector<4x256xf32>
    %250 = arith.addf %244, %249 : vector<4x256xf32>
    %251 = vector.extract_strided_slice %16 {offsets = [0, 30], sizes = [4, 1], strides = [1, 1]} : vector<4x36xf32> to vector<4x1xf32>
    %252 = vector.extract_strided_slice %238 {offsets = [2, 0], sizes = [1, 256], strides = [1, 1]} : vector<4x256xf32> to vector<1x256xf32>
    %253 = vector.broadcast %251 : vector<4x1xf32> to vector<4x256xf32>
    %254 = vector.broadcast %252 : vector<1x256xf32> to vector<4x256xf32>
    %255 = arith.mulf %253, %254 : vector<4x256xf32>
    %256 = arith.addf %250, %255 : vector<4x256xf32>
    %257 = vector.extract_strided_slice %16 {offsets = [0, 31], sizes = [4, 1], strides = [1, 1]} : vector<4x36xf32> to vector<4x1xf32>
    %258 = vector.extract_strided_slice %238 {offsets = [3, 0], sizes = [1, 256], strides = [1, 1]} : vector<4x256xf32> to vector<1x256xf32>
    %259 = vector.broadcast %257 : vector<4x1xf32> to vector<4x256xf32>
    %260 = vector.broadcast %258 : vector<1x256xf32> to vector<4x256xf32>
    %261 = arith.mulf %259, %260 : vector<4x256xf32>
    %262 = arith.addf %256, %261 : vector<4x256xf32>
    %263 = vector.extract_strided_slice %20 {offsets = [0, 145], sizes = [4, 256], strides = [1, 1]} : vector<4x512xf32> to vector<4x256xf32>
    %cst_22 = arith.constant 0.000000e+00 : f32
    %264 = vector.shape_cast %41 : vector<1x256xi1> to vector<1x256xi1>
    %265 = vector.broadcast %264 : vector<1x256xi1> to vector<4x256xi1>
    %266 = vector.broadcast %cst_22 : f32 to vector<4x256xf32>
    %267 = arith.select %265, %263, %266 : vector<4x256xi1>, vector<4x256xf32>
    %268 = vector.extract_strided_slice %16 {offsets = [0, 32], sizes = [4, 1], strides = [1, 1]} : vector<4x36xf32> to vector<4x1xf32>
    %269 = vector.extract_strided_slice %267 {offsets = [0, 0], sizes = [1, 256], strides = [1, 1]} : vector<4x256xf32> to vector<1x256xf32>
    %270 = vector.broadcast %268 : vector<4x1xf32> to vector<4x256xf32>
    %271 = vector.broadcast %269 : vector<1x256xf32> to vector<4x256xf32>
    %272 = arith.mulf %270, %271 : vector<4x256xf32>
    %273 = arith.addf %262, %272 : vector<4x256xf32>
    %274 = vector.extract_strided_slice %16 {offsets = [0, 33], sizes = [4, 1], strides = [1, 1]} : vector<4x36xf32> to vector<4x1xf32>
    %275 = vector.extract_strided_slice %267 {offsets = [1, 0], sizes = [1, 256], strides = [1, 1]} : vector<4x256xf32> to vector<1x256xf32>
    %276 = vector.broadcast %274 : vector<4x1xf32> to vector<4x256xf32>
    %277 = vector.broadcast %275 : vector<1x256xf32> to vector<4x256xf32>
    %278 = arith.mulf %276, %277 : vector<4x256xf32>
    %279 = arith.addf %273, %278 : vector<4x256xf32>
    %280 = vector.extract_strided_slice %16 {offsets = [0, 34], sizes = [4, 1], strides = [1, 1]} : vector<4x36xf32> to vector<4x1xf32>
    %281 = vector.extract_strided_slice %267 {offsets = [2, 0], sizes = [1, 256], strides = [1, 1]} : vector<4x256xf32> to vector<1x256xf32>
    %282 = vector.broadcast %280 : vector<4x1xf32> to vector<4x256xf32>
    %283 = vector.broadcast %281 : vector<1x256xf32> to vector<4x256xf32>
    %284 = arith.mulf %282, %283 : vector<4x256xf32>
    %285 = arith.addf %279, %284 : vector<4x256xf32>
    %286 = vector.extract_strided_slice %16 {offsets = [0, 35], sizes = [4, 1], strides = [1, 1]} : vector<4x36xf32> to vector<4x1xf32>
    %287 = vector.extract_strided_slice %267 {offsets = [3, 0], sizes = [1, 256], strides = [1, 1]} : vector<4x256xf32> to vector<1x256xf32>
    %288 = vector.broadcast %286 : vector<4x1xf32> to vector<4x256xf32>
    %289 = vector.broadcast %287 : vector<1x256xf32> to vector<4x256xf32>
    %290 = arith.mulf %288, %289 : vector<4x256xf32>
    %291 = arith.addf %285, %290 : vector<4x256xf32>
    %c0_23 = arith.constant 0 : index
    %c0_24 = arith.constant 0 : index
    %c0_25 = arith.constant 0 : index
    %292 = vector.load %arg4[%c0_23, %c0_24, %c0_25] : memref<1x4x256xf32, #tpu.memory_space<vmem>>, vector<1x4x256xf32>
    %293 = vector.shape_cast %292 : vector<1x4x256xf32> to vector<4x256xf32>
    %294 = vector.shape_cast %291 : vector<4x256xf32> to vector<1x4x256xf32>
    tpu.vector_store %arg4[%c0_23, %c0_24, %c0_25], %294 {strides = array<i32>} : memref<1x4x256xf32, #tpu.memory_space<vmem>>, vector<1x4x256xf32>,
    return
  }
  func.func @transform_0(%arg0: i32) -> i32 {
    %c0_i32 = arith.constant 0 : i32
    %c0_i32_0 = arith.constant 0 : i32
    return %c0_i32 : i32
  }
  func.func @transform_1(%arg0: i32) -> (i32, i32, i32) {
    %c0_i32 = arith.constant 0 : i32
    %c0_i32_0 = arith.constant 0 : i32
    %c0_i32_1 = arith.constant 0 : i32
    %c0_i32_2 = arith.constant 0 : i32
    return %c0_i32, %c0_i32_0, %c0_i32_1 : i32, i32, i32
  }
  func.func @transform_2(%arg0: i32) -> (i32, i32, i32) {
    %c0_i32 = arith.constant 0 : i32
    %c0_i32_0 = arith.constant 0 : i32
    %c0_i32_1 = arith.constant 0 : i32
    return %arg0, %c0_i32, %c0_i32_0 : i32, i32, i32
  }
  func.func @transform_3(%arg0: i32) -> (i32, i32, i32) {
    %c0_i32 = arith.constant 0 : i32
    %c0_i32_0 = arith.constant 0 : i32
    %c0_i32_1 = arith.constant 0 : i32
    return %arg0, %c0_i32, %c0_i32_0 : i32, i32, i32
  }
}

</mosaic_0001>

<bundles_post_ra>
// kernel: spline_linear_forward.1
= control target key start
LH: loop header
LB: loop body
LE: loop exit
PB: predicated region body
PF: predicated region fallthrough
CT: control target
= control target key end

     0   :  { %8 = vsyncpa [#allocation3], 0  ;;  %s1076_s12 = smov 0   ;;  %s1512_s0 = inlined_call_operand.vmem [shape: f32[3], index: 0, kind: input, shape index: {}]   ;;  %s1513_s1 = inlined_call_operand.vmem [shape: f32[3,4,36], index: 1, kind: input, shape index: {}]   ;;  %s1514_s2 = inlined_call_operand.vmem [shape: f32[2,4,256], index: 2, kind: input, shape index: {}]   ;;  %s1515_s3 = inlined_call_operand.vmem [shape: f32[2,4,256], index: 3, kind: output, shape index: {}]  }
   0x1 LB: > { %s863_s13 = sadd.s32 4294967295, %s1008_s12   ;;  %p865_p0 = scmp.ge.s32.totalorder %s1008_s12, 1  ;;  %s1008_s12 = sphi %s1076_s12, %s14_s12  }
   0x2   : > { %p113_p1 = scmp.lt.s32.totalorder %s1008_s12, 3  ;;  %s125_s16 = sshll.u32 %s1512_s0, 4  ;;  %s126_s16 = int_to_ptr.vmem [resolvable:$true] %s125_s16 }
   0x3   : > { %p890_p3 = scmp.eq.s32.totalorder %s863_s13, 0  ;;  %s1010_s17 = smov [#allocation2]  }
   0x4   : > { %p114_p2 = pnand %p865_p0, %p113_p1 }
   0x6   : > { %p886_p4 = pneg %p114_p2  ;;  %149 = sbr.rel (%p114_p2) target bundleno = 525 (0x20d), region = 32 }
   0x8   : > { %p887_p5 = pnand %p890_p3, %p886_p4 }
   0xa   : > { %889 = dma.vmem_to_smem (!%p887_p5), %s126_s16, 16, %s1010_s17, [#allocation3]  }
   0xb   : > { %1003 = dma.done.wait (%p890_p3), [#allocation3], 16  }
   0xc   : > { %1005 = vsyncadd (%p890_p3), [#allocation3], 4294967280 }
   0xd   : > { %156 = sfence }
   0xe   : > { %s185_s18 = sld [smem:[#allocation2]]  ;;  %v1516_v0 = vmov 0.0   ;;  %s1012_s19 = smov 17   ;;  %v1013_v1 = vmov 0   ;;  %v1014_v2 = vmov 1   ;;  %v1015_v3 = vmov 3  }
   0xf   : > { %244 = vrot.lane.b32.xlu0 %v1516_v0, %s1012_s19  ;;  %946 = vset.pattern.permute.xlu1 %v1013_v1  ;;  %s874_s20 = sld [smem:[#allocation2 + $0x1]]  ;;  %p175_p6 = scmp.lt.s32.totalorder %s863_s13, 1  ;;  %v186_v4 = vld [vmem:[%s1513_s1] sm:$0xf]  ;;  %v875_v5 = vld [vmem:[%s1513_s1 + $0x4] sm:$0xf]  ;;  %v208_v39 = vlaneseq }
  0x10   : > { %s876_s21 = sld [smem:[#allocation2 + $0x2]]  ;;  %947 = vset.pattern.permute.xlu2 %v1014_v2  ;;  %949 = vset.pattern.permute.xlu0 %v1015_v3  ;;  %v877_v7 = vld [vmem:[%s1513_s1 + $0x8] sm:$0xf]  ;;  %v1016_v18 = vmov 2   ;;  %v1017_v19 = vmov 4   ;;  %v1018_v20 = vmov 6  }
  0x11   : > { %s1539_s13 = smov (!%p175_p6, %s863_s13), 1  ;;  %v1019_v21 = vmov 5   ;;  %s1020_s5 = smov 15   ;;  %v1021_v22 = vmov 10   ;;  %v1022_v23 = vmov 8   ;;  %v1023_v24 = vmov 7  }
  0x12   : > { %s880_s28 = sshll.u32 %s1539_s13, 3  ;;  %v1024_v25 = vmov 9   ;;  %s1025_s6 = smov 1   ;;  %v1026_v26 = vmov 12   ;;  %v1027_v27 = vmov 11   ;;  %v1028_v28 = vmov 13  }
  0x13   : > { %s179_s4 = scalar_lea.vmem %s1514_s2, %s880_s28  ;;  %v1029_v29 = vmov 14   ;;  %v1030_v30 = vmov 15   ;;  %v1031_v31 = vmov 16   ;;  %v1032_v32 = vmov 19   ;;  %s1035_s7 = smov 127  }
  0x14   : > { %v187_v6 = vstv %s185_s18  ;;  %v201_v12 = vld [vmem:[%s179_s4] sm:$0xff]  ;;  %v1033_v33 = vmov 17   ;;  %v1034_v34 = vmov 18   ;;  %v1036_v35 = vmov 21   ;;  %s1038_s8 = smov 16   ;;  %s1039_s9 = smov 113  }
  0x15   : > { %v188_v8 = vmul.f32 %v187_v6, %v186_v4  ;;  %v192_v9 = vstv %s874_s20  ;;  %203 = vst [vmem:[#allocation1] ss:$2 sm:$0xff] %v201_v12  ;;  %v1037_v37 = vmov 20   ;;  %v1147_v40 = vperm.slane %v1516_v0, 2  ;;  %s1050_s10 = smov 112   ;;  %s1051_s11 = smov 111  }
  0x16   : > { %v193_v10 = vmul.f32 %v875_v5, %v192_v9  ;;  %v198_v11 = vstv %s876_s21  ;;  %v1151_v43 = vand.u32 127, %v208_v39  ;;  %vm250_vm0 = vcmask 138240   ;;  %s184_s16 = scalar_lea.vmem %s1515_s3, %s880_s28 }
  0x17   : > { %v199_v13 = vmul.f32 %v877_v7, %v198_v11  ;;  %1522 = vst [vmem:[#allocation6_spill] sm:$0xff] %v1147_v40  ;;  %vm409_vm3 = vcmask 121856   ;;  %vm462_vm6 = vcmask 7168   ;;  %vm547_vm7 = vcmask 1039360  }
  0x18   : > { %v194_v14 = vadd.f32 %v193_v10, %v188_v8  ;;  %v215_v45 = vand.u32 15, %v1151_v43  ;;  %v1158_v46 = vadd.s32 128, %v1151_v43  ;;  %v1183_v10 = vperm.slane %v1516_v0, 0 }
  0x19   : > { %vm317_vm8 = vcmask 130048   ;;  %vm600_vm9 = vcmask 924672   ;;  %vm663_vm10 = vcmask 916480   ;;  %vm742_vm11 = vcmask 908288  }
  0x1a   : > { %v1106_v15 = vadd.f32 %v199_v13, %v194_v14  ;;  %vm1162_vm1 = vcmp.ne.s32.totalorder %v215_v45, 0  ;;  %v222_v50 = vand.u32 15, %v1158_v46  ;;  %vm1230_vm4 = vcmp.ne.s32.totalorder %v215_v45, 15 }
  0x1b   : > { %vm792_vm12 = vcmask 1043456  }
  0x1c   : > { %259 = vperm.xlu1 %946, %v1106_v15   ;;  %269 = vperm.xlu2 %947, %v1106_v15   ;;  %v1110_v16 = vld.sshfl [vmem:[#allocation1] sm:$0xff pattern:$0x75316420]  ;;  %v1114_v17 = vld.sshfl [vmem:[#allocation1 + $0x8] sm:$0xff pattern:$0x75316420] }
  0x1d   : > { %246 = vrot.lane.b32.xlu0 %v1110_v16, %s1012_s19  ;;  %1521 = vst [vmem:[#allocation5_spill] sm:$0xff] %v1114_v17  ;;  %vm1175_vm2 = vcmp.ne.s32.totalorder %v222_v50, 0  ;;  %v1186_v11 = vperm.slane %v1110_v16, 0  ;;  %vm1236_vm5 = vcmp.ne.s32.totalorder %v222_v50, 15 }
  0x24   : > { %248 = vrot.lane.b32.xlu1 %v1114_v17, %s1012_s19  ;;  %948 = vset.pattern.permute.xlu2 %v1016_v18 }
  0x25   : > { %279 = vperm.xlu2 %948, %v1106_v15   ;;  %950 = vset.pattern.permute.xlu1 %v1017_v19 }
  0x26   : > { %289 = vperm.xlu0 %949, %v1106_v15  }
  0x2c   : > { %299 = vperm.xlu1 %950, %v1106_v15  }
  0x2d   : > { %952 = vset.pattern.permute.xlu2 %v1018_v20 }
  0x2e   : > { %350 = vperm.xlu2 %952, %v1106_v15   ;;  %951 = vset.pattern.permute.xlu0 %v1019_v21 }
  0x2f   : > { %325 = vperm.xlu0 %951, %v1106_v15  }
  0x34   : > { %407 = vrot.lane.b32.xlu1 %v1114_v17, %s1020_s5 }
  0x35   : > { %956 = vset.pattern.permute.xlu1 %v1021_v22 }
  0x36   : > { %403 = vrot.lane.b32.xlu2 %v1516_v0, %s1020_s5 }
  0x37   : > { %954 = vset.pattern.permute.xlu2 %v1022_v23  ;;  %953 = vset.pattern.permute.xlu0 %v1023_v24 }
  0x38   : > { %375 = vperm.xlu0 %953, %v1106_v15  }
  0x3c   : > { %437 = vperm.xlu1 %956, %v1106_v15  }
  0x3e   : > { %417 = vperm.xlu2 %954, %v1106_v15  }
  0x40   : > { %405 = vrot.lane.b32.xlu0 %v1110_v16, %s1020_s5 }
  0x41   : > { %955 = vset.pattern.permute.xlu0 %v1024_v25 }
  0x44   : > { %456 = vrot.lane.b32.xlu1 %v1516_v0, %s1025_s6 }
  0x45   : > { %958 = vset.pattern.permute.xlu1 %v1026_v26 }
  0x46   : > { %957 = vset.pattern.permute.xlu2 %v1027_v27  ;;  %v1201_v27 = vperm.slane %v1516_v0, 1 }
  0x47   : > { %447 = vperm.xlu2 %957, %v1106_v15  }
  0x48   : > { %427 = vperm.xlu0 %955, %v1106_v15  }
  0x4c   : > { %470 = vperm.xlu1 %958, %v1106_v15  }
  0x4f   : > { %458 = vrot.lane.b32.xlu2 %v1110_v16, %s1025_s6 }
  0x50   : > { %959 = vset.pattern.permute.xlu2 %v1028_v28  ;;  %460 = vrot.lane.b32.xlu0 %v1114_v17, %s1025_s6 }
  0x51   : > { %960 = vset.pattern.permute.xlu0 %v1029_v29  ;;  %v1040_v29 = vmov 23  }
  0x54   : > { %961 = vset.pattern.permute.xlu1 %v1030_v30  ;;  %v1204_v30 = vperm.slane %v1114_v17, 0 }
  0x55   : > { %500 = vperm.xlu1 %961, %v1106_v15  }
  0x57   : > { %480 = vperm.xlu2 %959, %v1106_v15  }
  0x58   : > { %490 = vperm.xlu0 %960, %v1106_v15  }
  0x5d   : > { %963 = vset.pattern.permute.xlu1 %v1033_v33 }
  0x5e   : > { %518 = vperm.xlu1 %963, %v1106_v15  }
  0x5f   : > { %962 = vset.pattern.permute.xlu2 %v1031_v31 }
  0x60   : > { %510 = vperm.xlu2 %962, %v1106_v15   ;;  %965 = vset.pattern.permute.xlu0 %v1032_v32 }
  0x61   : > { %534 = vperm.xlu0 %965, %v1106_v15  }
  0x66   : > { %541 = vrot.lane.b32.xlu1 %v1110_v16, %s1035_s7 }
  0x68   : > { %964 = vset.pattern.permute.xlu2 %v1034_v34 }
  0x69   : > { %526 = vperm.xlu2 %964, %v1106_v15   ;;  %967 = vset.pattern.permute.xlu0 %v1036_v35  ;;  %v1041_v35 = vmov 22  }
  0x6a   : > { %968 = vset.pattern.permute.xlu1 %v1041_v35 }
  0x6e   : > { %545 = vrot.lane.b32.xlu1 %v1516_v0, %s1035_s7 }
  0x71   : > { %543 = vrot.lane.b32.xlu2 %v1114_v17, %s1035_s7 }
  0x72   : > { %966 = vset.pattern.permute.xlu2 %v1037_v37  ;;  %v1214_v37 = vperm.slane %v1110_v16, 1 }
  0x76   : > { %v270_v36 = vpop.permute.xlu2 %269 }
  0x79   : > { %555 = vperm.xlu2 %966, %v1106_v15  }
  0x7f   : > { %v280_v38 = vpop.permute.xlu2 %279 }
  0x81   : > { %v245_v41 = vpop.permute.xlu0 %244  ;;  %969 = vset.pattern.permute.xlu2 %v1040_v29 }
  0x88   : > { %v1149_v42 = vpop.permute.xlu2 %350 }
  0x89   : > { %v356_v44 = vmul.f32 %v1147_v40, %v1149_v42 }
  0x8b   : > { %362 = vrot.lane.b32.xlu0 %v356_v44, %s1038_s8 }
  0x8e   : > { %v260_v47 = vpop.permute.xlu1 %259 }
  0x8f   : > { %v247_v49 = vpop.permute.xlu0 %246 }
  0x90   : > { %v1167_v51 = vpop.permute.xlu2 %403  ;;  %v251_v52 = vsel %vm250_vm0, %v245_v41, %v247_v49 }
  0x91   : > { %v255_v53 = vsel %vm1162_vm1, %v251_v52, 0.0  ;;  %v1224_v52 = vperm.slane %v1114_v17, 2 }
  0x92   : > { %v262_v54 = vperm.slane %v255_v53, 0  ;;  %v272_v55 = vperm.slane %v255_v53, 1  ;;  %v282_v56 = vperm.slane %v255_v53, 2  ;;  %v292_v2 = vperm.slane %v255_v53, 3 }
  0x93   : > { %565 = vperm.xlu0 %967, %v1106_v15   ;;  %v1527_v53 = vmov 0  ;;  %v358_v45 = vmul.f32 %v1224_v52, %v1149_v42 }
  0x94   : > { %v264_v58 = vmul.f32 %v262_v54, %v260_v47  ;;  %v274_v59 = vmul.f32 %v272_v55, %v270_v36  ;;  %v284_v61 = vmul.f32 %v282_v56, %v280_v38  ;;  %v1528_v53 = vsel %vm1230_vm4, 4294967295, %v1527_v53 }
  0x95   : > { %1529 = vst [vmem:[#allocation7_spill] sm:$0xff] %v1528_v53  ;;  %v1530_v54 = vmov 0  ;;  %v1042_v55 = vmov 26  }
  0x96   : > { %v249_v60 = vpop.permute.xlu1 %248  ;;  %v276_v1 = vadd.f32 %v274_v59, %v264_v58  ;;  %v1531_v54 = vsel %vm1236_vm5, 4294967295, %v1530_v54 }
  0x97   : > { %v252_v62 = vsel %vm250_vm0, %v247_v49, %v249_v60  ;;  %v1221_v49 = vperm.slane %v1110_v16, 2  ;;  %1532 = vst [vmem:[#allocation8_spill] sm:$0xff] %v1531_v54 }
  0x98   : > { %v256_v63 = vsel %vm1175_vm2, %v252_v62, 0.0  ;;  %v290_v7 = vpop.permute.xlu0 %289  ;;  %v286_v8 = vadd.f32 %v284_v61, %v276_v1  ;;  %v1188_v19 = vpop.permute.xlu2 %417 }
  0x99   : > { %v263_v3 = vperm.slane %v256_v63, 0  ;;  %v273_v4 = vperm.slane %v256_v63, 1  ;;  %v283_v5 = vperm.slane %v256_v63, 2  ;;  %v293_v6 = vperm.slane %v256_v63, 3 }
  0x9a   : > { %v294_v9 = vmul.f32 %v292_v2, %v290_v7  ;;  %v357_v43 = vmul.f32 %v1221_v49, %v1149_v42  ;;  %v1258_v63 = vperm.slane %v1516_v0, 3 }
  0x9b   : > { %v265_v12 = vmul.f32 %v263_v3, %v260_v47  ;;  %v275_v13 = vmul.f32 %v273_v4, %v270_v36  ;;  %v285_v14 = vmul.f32 %v283_v5, %v280_v38  ;;  %v295_v18 = vmul.f32 %v293_v6, %v290_v7  ;;  %598 = vrot.lane.b32.xlu0 %v1516_v0, %s1039_s9 }
  0x9c   : > { %v1192_v20 = vadd.f32 %v294_v9, %v286_v8  ;;  %v1211_v36 = vperm.slane %v1114_v17, 1  ;;  %972 = vset.pattern.permute.xlu0 %v1042_v55  ;;  %v1264_v3 = vperm.slane %v1110_v16, 3 }
  0x9d   : > { %v277_v21 = vadd.f32 %v275_v13, %v265_v12 }
  0x9e   : > { %v300_v22 = vpop.permute.xlu1 %299 }
  0x9f   : > { %v287_v23 = vadd.f32 %v285_v14, %v277_v21  ;;  %v305_v24 = vmul.f32 %v1183_v10, %v300_v22  ;;  %v306_v25 = vmul.f32 %v1186_v11, %v300_v22  ;;  %v307_v34 = vmul.f32 %v1204_v30, %v300_v22 }
  0xa0   : > { %v1043_v21 = vmov 27  }
  0xa1   : > { %v1196_v26 = vadd.f32 %v295_v18, %v287_v23  ;;  %311 = vrot.lane.b32.xlu2 %v305_v24, %s1038_s8  ;;  %313 = vrot.lane.b32.xlu1 %v306_v25, %s1038_s8  ;;  %v326_v28 = vpop.permute.xlu0 %325  ;;  %v448_v32 = vpop.permute.xlu2 %447 }
  0xa2   : > { %v331_v31 = vmul.f32 %v1201_v27, %v326_v28  ;;  %v332_v41 = vmul.f32 %v1214_v37, %v326_v28  ;;  %v333_v44 = vmul.f32 %v1211_v36, %v326_v28 }
  0xa3   : > { %628 = vperm.xlu0 %972, %v1106_v15  }
  0xa6   : > { %v408_v33 = vpop.permute.xlu1 %407 }
  0xa9   : > { %315 = vrot.lane.b32.xlu2 %v307_v34, %s1038_s8  ;;  %337 = vrot.lane.b32.xlu1 %v331_v31, %s1038_s8  ;;  %v459_v47 = vpop.permute.xlu2 %458  ;;  %v1300_v31 = vperm.slane %v1114_v17, 3 }
  0xaa   : > { %v1216_v38 = vpop.permute.xlu0 %375 }
  0xab   : > { %977 = vset.pattern.permute.xlu0 %v1043_v21  ;;  %v381_v23 = vmul.f32 %v1258_v63, %v1216_v38  ;;  %v382_v24 = vmul.f32 %v1264_v3, %v1216_v38  ;;  %v1046_v21 = vmov 29  }
  0xac   : > { %638 = vperm.xlu0 %977, %v1106_v15  }
  0xae   : > { %v438_v39 = vpop.permute.xlu1 %437 }
  0xb1   : > { %339 = vrot.lane.b32.xlu2 %v332_v41, %s1038_s8  ;;  %341 = vrot.lane.b32.xlu1 %v333_v44, %s1038_s8  ;;  %v481_v9 = vpop.permute.xlu2 %480 }
  0xb2   : > { %v406_v56 = vpop.permute.xlu0 %405 }
  0xb3   : > { %v410_v58 = vsel %vm409_vm3, %v1167_v51, %v406_v56  ;;  %v411_v59 = vsel %vm409_vm3, %v406_v56, %v408_v33 }
  0xb4   : > { %v1248_v46 = vsel %vm1230_vm4, %v410_v58, 0.0  ;;  %v1252_v50 = vsel %vm1236_vm5, %v411_v59, 0.0  ;;  %v383_v58 = vmul.f32 %v1300_v31, %v1216_v38  ;;  %v1044_v38 = vmov 25  }
  0xb5   : > { %v421_v60 = vperm.slane %v1252_v50, 0  ;;  %v440_v51 = vperm.slane %v1248_v46, 2  ;;  %v441_v61 = vperm.slane %v1252_v50, 2  ;;  %v450_v42 = vperm.slane %v1248_v46, 3 }
  0xb6   : > { %v457_v62 = vpop.permute.xlu1 %456  ;;  %v451_v1 = vperm.slane %v1252_v50, 3  ;;  %v420_v29 = vperm.slane %v1248_v46, 0  ;;  %v430_v40 = vperm.slane %v1248_v46, 1  ;;  %v431_v46 = vperm.slane %v1252_v50, 1 }
  0xb7   : > { %v463_v2 = vsel %vm462_vm6, %v457_v62, %v459_v47  ;;  %v1266_v4 = vmul.f32 %v440_v51, %v438_v39  ;;  %v1268_v5 = vmul.f32 %v441_v61, %v438_v39  ;;  %v1276_v7 = vmul.f32 %v450_v42, %v448_v32 }
  0xb8   : > { %v1272_v6 = vsel %vm1162_vm1, %v463_v2, 0.0  ;;  %v1278_v8 = vmul.f32 %v451_v1, %v448_v32  ;;  %v1282_v13 = vmul.f32 %v421_v60, %v1188_v19  ;;  %v1311_v41 = vmul.f32 %v420_v29, %v1188_v19 }
  0xb9   : > { %366 = vrot.lane.b32.xlu2 %v358_v45, %s1038_s8  ;;  %364 = vrot.lane.b32.xlu1 %v357_v43, %s1038_s8  ;;  %v483_v12 = vperm.slane %v1272_v6, 1  ;;  %v473_v22 = vperm.slane %v1272_v6, 0  ;;  %v503_v35 = vperm.slane %v1272_v6, 3  ;;  %v1045_v62 = vmov 24  }
  0xba   : > { %v1286_v18 = vpop.permute.xlu0 %427  ;;  %v1302_v32 = vpop.permute.xlu2 %510  ;;  %v1047_v29 = vmov 28  }
  0xbb   : > { %v1284_v14 = vmul.f32 %v483_v12, %v481_v9 }
  0xbe   : > { %v471_v25 = vpop.permute.xlu1 %470 }
  0xbf   : > { %v1294_v28 = vmul.f32 %v473_v22, %v471_v25 }
  0xc1   : > { %389 = vrot.lane.b32.xlu2 %v382_v24, %s1038_s8  ;;  %387 = vrot.lane.b32.xlu1 %v381_v23, %s1038_s8 }
  0xc2   : > { %v461_v33 = vpop.permute.xlu0 %460 }
  0xc3   : > { %v464_v34 = vsel %vm462_vm6, %v459_v47, %v461_v33  ;;  %v1328_v19 = vpop.permute.xlu2 %526 }
  0xc4   : > { %v1308_v39 = vsel %vm1175_vm2, %v464_v34, 0.0  ;;  %v530_v48 = vmul.f32 %v1328_v19, %v1224_v52 }
  0xc5   : > { %v474_v44 = vperm.slane %v1308_v39, 0  ;;  %v484_v55 = vperm.slane %v1308_v39, 1  ;;  %v504_v56 = vperm.slane %v1308_v39, 3 }
  0xc7   : > { %v501_v59 = vpop.permute.xlu1 %500  ;;  %v1318_v47 = vmul.f32 %v474_v44, %v471_v25  ;;  %v1320_v43 = vmul.f32 %v484_v55, %v481_v9  ;;  %v1049_v44 = vmov 30  }
  0xc8   : > { %v1322_v45 = vmul.f32 %v503_v35, %v501_v59  ;;  %v1324_v60 = vmul.f32 %v504_v56, %v501_v59  ;;  %v1048_v35 = vmov 31  }
  0xc9   : > { %585 = vperm.xlu2 %969, %v1106_v15   ;;  %391 = vrot.lane.b32.xlu1 %v383_v58, %s1038_s8 }
  0xca   : > { %v1357_v59 = vpop.permute.xlu0 %490 }
  0xcb   : > { %v544_v61 = vpop.permute.xlu2 %543 }
  0xd0   : > { %v1333_v51 = vpop.permute.xlu1 %518 }
  0xd1   : > { %575 = vperm.xlu1 %968, %v1106_v15   ;;  %596 = vrot.lane.b32.xlu2 %v1114_v17, %s1039_s9 }
  0xd2   : > { %971 = vset.pattern.permute.xlu2 %v1044_v38 }
  0xd3   : > { %v556_v12 = vpop.permute.xlu2 %555 }
  0xd8   : > { %v542_v42 = vpop.permute.xlu1 %541 }
  0xd9   : > { %594 = vrot.lane.b32.xlu1 %v1110_v16, %s1039_s9  ;;  %618 = vperm.xlu2 %971, %v1106_v15   ;;  %v548_v1 = vsel %vm547_vm7, %v542_v42, %v544_v61 }
  0xda   : > { %970 = vset.pattern.permute.xlu1 %v1045_v62  ;;  %v1340_v2 = vsel %vm1230_vm4, %v548_v1, 0.0 }
  0xdb   : > { %v558_v9 = vperm.slane %v1340_v2, 0 }
  0xdd   : > { %v1345_v22 = vmul.f32 %v558_v9, %v556_v12 }
  0xe0   : > { %v546_v23 = vpop.permute.xlu1 %545 }
  0xe1   : > { %608 = vperm.xlu1 %970, %v1106_v15   ;;  %974 = vset.pattern.permute.xlu2 %v1046_v21  ;;  %v549_v24 = vsel %vm547_vm7, %v544_v61, %v546_v23 }
  0xe2   : > { %671 = vperm.xlu2 %974, %v1106_v15   ;;  %v1349_v25 = vsel %vm1236_vm5, %v549_v24, 0.0 }
  0xe3   : > { %v559_v33 = vperm.slane %v1349_v25, 0 }
  0xe5   : > { %v1353_v34 = vmul.f32 %v559_v33, %v556_v12  ;;  %v1363_v12 = vpop.permute.xlu0 %534  ;;  %v588_v33 = vperm.slane %v1340_v2, 3 }
  0xe9   : > { %973 = vset.pattern.permute.xlu1 %v1047_v29 }
  0xea   : > { %648 = vperm.xlu1 %973, %v1106_v15   ;;  %976 = vset.pattern.permute.xlu2 %v1048_v35  ;;  %v589_v35 = vperm.slane %v1349_v25, 3 }
  0xeb   : > { %715 = vperm.xlu2 %976, %v1106_v15  }
  0xf2   : > { %975 = vset.pattern.permute.xlu1 %v1049_v44 }
  0xf3   : > { %693 = vperm.xlu1 %975, %v1106_v15  }
  0xfb   : > { %v312_v55 = vpop.permute.xlu2 %311 }
 0x103   : > { %v316_v56 = vpop.permute.xlu2 %315 }
 0x10b   : > { %v340_v58 = vpop.permute.xlu2 %339 }
 0x113   : > { %v367_v38 = vpop.permute.xlu2 %366  ;;  %v314_v61 = vpop.permute.xlu1 %313 }
 0x114   : > { %v318_v62 = vsel %vm317_vm8, %v312_v55, %v314_v61  ;;  %v319_v42 = vsel %vm317_vm8, %v314_v61, %v316_v56  ;;  %v363_v55 = vpop.permute.xlu0 %362 }
 0x115   : > { %v322_v1 = vadd.f32 %v318_v62, %v1192_v20  ;;  %v323_v9 = vadd.f32 %v319_v42, %v1196_v26 }
 0x11b   : > { %v390_v21 = vpop.permute.xlu2 %389  ;;  %v338_v23 = vpop.permute.xlu1 %337 }
 0x11c   : > { %v343_v24 = vsel %vm317_vm8, %v338_v23, %v340_v58  ;;  %v1377_v54 = vpop.permute.xlu0 %565 }
 0x11d   : > { %v347_v29 = vadd.f32 %v343_v24, %v322_v1 }
 0x123   : > { %v586_v44 = vpop.permute.xlu2 %585  ;;  %v342_v0 = vpop.permute.xlu1 %341 }
 0x124   : > { %v1368_v53 = vmul.f32 %v588_v33, %v586_v44  ;;  %v1370_v56 = vmul.f32 %v589_v35, %v586_v44  ;;  %v344_v20 = vsel %vm317_vm8, %v340_v58, %v342_v0  ;;  %v599_v58 = vpop.permute.xlu0 %598 }
 0x125   : > { %v348_v26 = vadd.f32 %v344_v20, %v323_v9  ;;  %v432_v9 = vmul.f32 %v430_v40, %v1286_v18 }
 0x12b   : > { %v365_v61 = vpop.permute.xlu1 %364  ;;  %v1373_v62 = vpop.permute.xlu2 %596 }
 0x12c   : > { %v368_v42 = vsel %vm317_vm8, %v363_v55, %v365_v61  ;;  %v369_v1 = vsel %vm317_vm8, %v365_v61, %v367_v38  ;;  %v602_v38 = vsel %vm600_vm9, %v1373_v62, %v599_v58 }
 0x12d   : > { %v372_v23 = vadd.f32 %v368_v42, %v347_v29  ;;  %v373_v24 = vadd.f32 %v369_v1, %v348_v26  ;;  %v1389_v55 = vsel %vm1175_vm2, %v602_v38, 0.0  ;;  %v494_v38 = vperm.slane %v1308_v39, 2 }
 0x12e   : > { %v622_v61 = vperm.slane %v1389_v55, 1 }
 0x133   : > { %v388_v33 = vpop.permute.xlu1 %387  ;;  %v1380_v17 = vpop.permute.xlu2 %618 }
 0x134   : > { %v393_v35 = vsel %vm317_vm8, %v388_v33, %v390_v21  ;;  %v1400_v57 = vmul.f32 %v622_v61, %v1380_v17  ;;  %v1533_v61 = vmov 0.0  }
 0x135   : > { %v397_v0 = vadd.f32 %v393_v35, %v372_v23 }
 0x137   : > { %v424_v44 = vadd.f32 %v1311_v41, %v397_v0  ;;  %v493_v41 = vperm.slane %v1272_v6, 2  ;;  %v579_v0 = vperm.slane %v1349_v25, 2 }
 0x139   : > { %v434_v29 = vadd.f32 %v432_v9, %v424_v44  ;;  %v495_v6 = vmul.f32 %v493_v41, %v1357_v59  ;;  %v568_v41 = vperm.slane %v1340_v2, 1 }
 0x13b   : > { %v444_v20 = vadd.f32 %v1266_v4, %v434_v29  ;;  %v392_v26 = vpop.permute.xlu1 %391  ;;  %v433_v4 = vmul.f32 %v431_v46, %v1286_v18  ;;  %v521_v46 = vmul.f32 %v1333_v51, %v1214_v37 }
 0x13c   : > { %v394_v42 = vsel %vm317_vm8, %v390_v21, %v392_v26  ;;  %v1395_v40 = vpop.permute.xlu2 %671 }
 0x13d   : > { %v454_v1 = vadd.f32 %v1276_v7, %v444_v20  ;;  %v398_v23 = vadd.f32 %v394_v42, %v373_v24  ;;  %v675_v50 = vmul.f32 %v1395_v40, %v1211_v36  ;;  %v578_v24 = vperm.slane %v1340_v2, 2 }
 0x13e   : > { %v496_v42 = vmul.f32 %v494_v38, %v1357_v59  ;;  %v570_v2 = vmul.f32 %v568_v41, %v1377_v54  ;;  %v632_v41 = vperm.slane %v1389_v55, 2 }
 0x13f   : > { %v477_v33 = vadd.f32 %v1294_v28, %v454_v1  ;;  %v425_v35 = vadd.f32 %v1282_v13, %v398_v23  ;;  %682 = vrot.lane.b32.xlu0 %v675_v50, %s1050_s10  ;;  %v513_v13 = vmul.f32 %v1302_v32, %v1186_v11 }
 0x141   : > { %v487_v7 = vadd.f32 %v1284_v14, %v477_v33  ;;  %v435_v21 = vadd.f32 %v433_v4, %v425_v35  ;;  %v514_v4 = vmul.f32 %v1302_v32, %v1204_v30 }
 0x143   : > { %v497_v58 = vadd.f32 %v495_v6, %v487_v7  ;;  %v445_v9 = vadd.f32 %v1268_v5, %v435_v21  ;;  %v576_v18 = vpop.permute.xlu1 %575  ;;  %v529_v5 = vmul.f32 %v1328_v19, %v1221_v49 }
 0x144   : > { %v580_v44 = vmul.f32 %v578_v24, %v576_v18  ;;  %v581_v28 = vmul.f32 %v579_v0, %v576_v18  ;;  %v629_v24 = vpop.permute.xlu0 %628 }
 0x145   : > { %v455_v29 = vadd.f32 %v1278_v8, %v445_v9  ;;  %v507_v14 = vadd.f32 %v1322_v45, %v497_v58  ;;  %v537_v8 = vmul.f32 %v1363_v12, %v1264_v3  ;;  %v1449_v0 = vpop.permute.xlu2 %715  ;;  %v1052_v58 = vmov 33  }
 0x146   : > { %979 = vset.pattern.permute.xlu0 %v1052_v58  ;;  %v569_v9 = vperm.slane %v1349_v25, 1  ;;  %v720_v19 = vmul.f32 %v1449_v0, %v1258_v63 }
 0x147   : > { %v478_v20 = vadd.f32 %v1318_v47, %v455_v29  ;;  %v515_v26 = vadd.f32 %v513_v13, %v507_v14  ;;  %740 = vrot.lane.b32.xlu0 %v1533_v61, %s1051_s11 }
 0x149   : > { %v488_v39 = vadd.f32 %v1320_v43, %v478_v20  ;;  %v523_v45 = vadd.f32 %v521_v46, %v515_v26  ;;  %v522_v43 = vmul.f32 %v1333_v51, %v1211_v36  ;;  %v538_v36 = vmul.f32 %v1363_v12, %v1300_v31 }
 0x14a   : > { %v571_v20 = vmul.f32 %v569_v9, %v1377_v54 }
 0x14b   : > { %v498_v1 = vadd.f32 %v496_v42, %v488_v39  ;;  %v531_v47 = vadd.f32 %v529_v5, %v523_v45  ;;  %v595_v23 = vpop.permute.xlu1 %594 }
 0x14c   : > { %v601_v50 = vsel %vm600_vm9, %v595_v23, %v1373_v62  ;;  %v612_v62 = vperm.slane %v1389_v55, 0 }
 0x14d   : > { %v508_v33 = vadd.f32 %v1324_v60, %v498_v1  ;;  %v539_v59 = vadd.f32 %v537_v8, %v531_v47  ;;  %v605_v35 = vsel %vm1162_vm1, %v601_v50, 0.0  ;;  %v642_v47 = vperm.slane %v1389_v55, 3 }
 0x14e   : > { %v621_v6 = vperm.slane %v605_v35, 1  ;;  %v631_v14 = vperm.slane %v605_v35, 2  ;;  %v641_v5 = vperm.slane %v605_v35, 3  ;;  %v634_v50 = vmul.f32 %v632_v41, %v629_v24 }
 0x14f   : > { %v516_v7 = vadd.f32 %v514_v4, %v508_v33  ;;  %v562_v21 = vadd.f32 %v1345_v22, %v539_v59  ;;  %736 = vrot.lane.b32.xlu0 %v1110_v16, %s1051_s11  ;;  %v611_v22 = vperm.slane %v605_v35, 0  ;;  %v1054_v59 = vmov 35  }
 0x150   : > { %v623_v32 = vmul.f32 %v621_v6, %v1380_v17  ;;  %v633_v42 = vmul.f32 %v631_v14, %v629_v24  ;;  %981 = vset.pattern.permute.xlu2 %v1054_v59  ;;  %v676_v35 = vmul.f32 %v1395_v40, %v1201_v27  ;;  %v718_v27 = vmul.f32 %v1449_v0, %v1264_v3 }
 0x151   : > { %v524_v60 = vadd.f32 %v522_v43, %v516_v7  ;;  %v572_v51 = vadd.f32 %v570_v2, %v562_v21  ;;  %v719_v2 = vmul.f32 %v1449_v0, %v1300_v31 }
 0x153   : > { %v532_v18 = vadd.f32 %v530_v48, %v524_v60  ;;  %v582_v17 = vadd.f32 %v580_v44, %v572_v51  ;;  %v609_v13 = vpop.permute.xlu1 %608  ;;  %v639_v44 = vpop.permute.xlu0 %638 }
 0x154   : > { %v613_v38 = vmul.f32 %v611_v22, %v609_v13  ;;  %v614_v16 = vmul.f32 %v612_v62, %v609_v13  ;;  %v643_v45 = vmul.f32 %v641_v5, %v639_v44 }
 0x155   : > { %v540_v29 = vadd.f32 %v538_v36, %v532_v18  ;;  %v592_v12 = vadd.f32 %v1368_v53, %v582_v17 }
 0x157   : > { %v563_v46 = vadd.f32 %v1353_v34, %v540_v29  ;;  %v615_v26 = vadd.f32 %v613_v38, %v592_v12  ;;  %728 = vrot.lane.b32.xlu0 %v720_v19, %s1050_s10 }
 0x159   : > { %v573_v25 = vadd.f32 %v571_v20, %v563_v46  ;;  %v625_v61 = vadd.f32 %v623_v32, %v615_v26 }
 0x15b   : > { %v583_v8 = vadd.f32 %v581_v28, %v573_v25  ;;  %v635_v39 = vadd.f32 %v633_v42, %v625_v61  ;;  %v1053_v28 = vmov 32  }
 0x15c   : > { %v649_v63 = vpop.permute.xlu1 %648  ;;  %978 = vset.pattern.permute.xlu1 %v1053_v28 }
 0x15d   : > { %v593_v53 = vadd.f32 %v1370_v56, %v583_v8  ;;  %v651_v34 = vmul.f32 %v649_v63, %v1186_v11  ;;  %v652_v54 = vmul.f32 %v649_v63, %v1204_v30  ;;  %v645_v1 = vadd.f32 %v643_v45, %v635_v39 }
 0x15e   : > { %v644_v56 = vmul.f32 %v642_v47, %v639_v44  ;;  %v674_v11 = vmul.f32 %v1395_v40, %v1214_v37  ;;  %v653_v33 = vmul.f32 %v649_v63, %v1183_v10  ;;  %v1535_v10 = vld [vmem:[#allocation6_spill] sm:$0xff] }
 0x15f   : > { %v616_v23 = vadd.f32 %v614_v16, %v593_v53  ;;  %659 = vrot.lane.b32.xlu2 %v652_v54, %s1050_s10  ;;  %657 = vrot.lane.b32.xlu1 %v651_v34, %s1050_s10 }
 0x160   : > { %760 = vperm.xlu0 %979, %v1106_v15  }
 0x161   : > { %v626_v4 = vadd.f32 %v1400_v57, %v616_v23  ;;  %v1534_v57 = vld [vmem:[#allocation5_spill] sm:$0xff] }
 0x163   : > { %v636_v30 = vadd.f32 %v634_v50, %v626_v4 }
 0x165   : > { %v646_v55 = vadd.f32 %v644_v56, %v636_v30  ;;  %v694_v37 = vpop.permute.xlu1 %693 }
 0x166   : > { %v697_v43 = vmul.f32 %v694_v37, %v1224_v52  ;;  %v698_v6 = vmul.f32 %v694_v37, %v1535_v10  ;;  %v696_v7 = vmul.f32 %v694_v37, %v1221_v49  ;;  %v1055_v52 = vmov 34  }
 0x167   : > { %680 = vrot.lane.b32.xlu2 %v674_v11, %s1050_s10  ;;  %661 = vrot.lane.b32.xlu1 %v653_v33, %s1050_s10 }
 0x168   : > { %982 = vset.pattern.permute.xlu0 %v1054_v59 }
 0x16f   : > { %738 = vrot.lane.b32.xlu2 %v1534_v57, %s1051_s11  ;;  %684 = vrot.lane.b32.xlu1 %v676_v35, %s1050_s10 }
 0x177   : > { %706 = vrot.lane.b32.xlu2 %v698_v6, %s1050_s10  ;;  %704 = vrot.lane.b32.xlu1 %v697_v43, %s1050_s10 }
 0x17f   : > { %726 = vrot.lane.b32.xlu2 %v719_v2, %s1050_s10  ;;  %702 = vrot.lane.b32.xlu1 %v696_v7, %s1050_s10 }
 0x187   : > { %724 = vrot.lane.b32.xlu2 %v718_v27, %s1050_s10  ;;  %750 = vperm.xlu1 %978, %v1106_v15  }
 0x18f   : > { %780 = vperm.xlu2 %981, %v1106_v15   ;;  %980 = vset.pattern.permute.xlu1 %v1055_v52 }
 0x190   : > { %770 = vperm.xlu1 %980, %v1106_v15  }
 0x1b1   : > { %v683_v21 = vpop.permute.xlu0 %682 }
 0x1b9   : > { %v660_v31 = vpop.permute.xlu2 %659  ;;  %v741_v32 = vpop.permute.xlu0 %740 }
 0x1c1   : > { %v681_v40 = vpop.permute.xlu2 %680  ;;  %v737_v60 = vpop.permute.xlu0 %736 }
 0x1c2   : > { %v686_v38 = vsel %vm663_vm10, %v681_v40, %v683_v21 }
 0x1c9   : > { %v739_v62 = vpop.permute.xlu2 %738  ;;  %v729_v17 = vpop.permute.xlu0 %728 }
 0x1ca   : > { %v744_v15 = vsel %vm742_vm11, %v739_v62, %v741_v32  ;;  %v743_v18 = vsel %vm742_vm11, %v737_v60, %v739_v62 }
 0x1cb   : > { %v748_v29 = vsel %vm1236_vm5, %v744_v15, 0.0  ;;  %v747_v12 = vsel %vm1230_vm4, %v743_v18, 0.0 }
 0x1cc   : > { %v753_v42 = vperm.slane %v747_v12, 0  ;;  %v754_v8 = vperm.slane %v748_v29, 0  ;;  %v763_v34 = vperm.slane %v747_v12, 1  ;;  %v764_v54 = vperm.slane %v748_v29, 1 }
 0x1cd   : > { %v784_v4 = vperm.slane %v748_v29, 3  ;;  %v773_v30 = vperm.slane %v747_v12, 2  ;;  %v774_v33 = vperm.slane %v748_v29, 2 }
 0x1d1   : > { %v658_v49 = vpop.permute.xlu1 %657  ;;  %v707_v36 = vpop.permute.xlu2 %706 }
 0x1d2   : > { %v664_v0 = vsel %vm663_vm10, %v658_v49, %v660_v31  ;;  %v761_v23 = vpop.permute.xlu0 %760 }
 0x1d3   : > { %v668_v9 = vadd.f32 %v664_v0, %v645_v1  ;;  %v765_v56 = vmul.f32 %v763_v34, %v761_v23  ;;  %v766_v11 = vmul.f32 %v764_v54, %v761_v23 }
 0x1d5   : > { %v690_v5 = vadd.f32 %v686_v38, %v668_v9 }
 0x1d9   : > { %v662_v24 = vpop.permute.xlu1 %661  ;;  %v727_v51 = vpop.permute.xlu2 %726 }
 0x1da   : > { %v665_v22 = vsel %vm663_vm10, %v660_v31, %v662_v24  ;;  %v731_v41 = vsel %vm663_vm10, %v727_v51, %v729_v17 }
 0x1db   : > { %v669_v16 = vadd.f32 %v665_v22, %v646_v55  ;;  %v783_v55 = vperm.slane %v747_v12, 3 }
 0x1e1   : > { %v685_v48 = vpop.permute.xlu1 %684  ;;  %v725_v25 = vpop.permute.xlu2 %724 }
 0x1e2   : > { %v687_v13 = vsel %vm663_vm10, %v683_v21, %v685_v48  ;;  %v730_v53 = vsel %vm663_vm10, %v725_v25, %v727_v51 }
 0x1e3   : > { %v691_v26 = vadd.f32 %v687_v13, %v669_v16 }
 0x1e9   : > { %v705_v3 = vpop.permute.xlu1 %704  ;;  %v781_v59 = vpop.permute.xlu2 %780 }
 0x1ea   : > { %v709_v46 = vsel %vm663_vm10, %v705_v3, %v707_v36  ;;  %v786_v6 = vmul.f32 %v784_v4, %v781_v59  ;;  %v785_v27 = vmul.f32 %v783_v55, %v781_v59 }
 0x1eb   : > { %v713_v44 = vadd.f32 %v709_v46, %v691_v26 }
 0x1ed   : > { %v735_v1 = vadd.f32 %v731_v41, %v713_v44 }
 0x1f1   : > { %v703_v58 = vpop.permute.xlu1 %702 }
 0x1f2   : > { %v708_v20 = vsel %vm663_vm10, %v703_v58, %v705_v3 }
 0x1f3   : > { %v712_v61 = vadd.f32 %v708_v20, %v690_v5 }
 0x1f5   : > { %v734_v47 = vadd.f32 %v730_v53, %v712_v61 }
 0x1f9   : > { %v751_v39 = vpop.permute.xlu1 %750 }
 0x1fa   : > { %v755_v45 = vmul.f32 %v753_v42, %v751_v39  ;;  %v756_v63 = vmul.f32 %v754_v8, %v751_v39 }
 0x1fc   : > { %v757_v28 = vadd.f32 %v755_v45, %v734_v47  ;;  %v758_v50 = vadd.f32 %v756_v63, %v735_v1 }
 0x1fe   : > { %v767_v57 = vadd.f32 %v765_v56, %v757_v28  ;;  %v768_v37 = vadd.f32 %v766_v11, %v758_v50 }
 0x202   : > { %v771_v35 = vpop.permute.xlu1 %770 }
 0x203   : > { %v775_v43 = vmul.f32 %v773_v30, %v771_v35  ;;  %v776_v10 = vmul.f32 %v774_v33, %v771_v35 }
 0x205   : > { %v777_v2 = vadd.f32 %v775_v43, %v767_v57  ;;  %v778_v7 = vadd.f32 %v776_v10, %v768_v37 }
 0x207   : > { %v788_v52 = vadd.f32 %v786_v6, %v778_v7  ;;  %v787_v31 = vadd.f32 %v785_v27, %v777_v2 }
 0x209   : > { %v791_v40 = vrot.slane %v788_v52, 4 }
 0x20b   : > { %v793_v49 = vsel %vm792_vm12, %v787_v31, %v791_v40 }
 0x20c   : > { %795 = vst [vmem:[%s184_s16] sm:$0xff] %v793_v49 }
 0x20d PF: > { %s14_s12 = sadd.s32 1, %s1008_s12  }
 0x20e   : > { %p11_p7 = scmp.ge.s32.totalorder %s14_s12, 4  }
 0x210   :  { %13 = sbr.rel (!%p11_p7) target bundleno = 1 (0x1), region = 69 }
 0x215   :  { %817 = vsyncpa [#allocation3], 1 }
 0x216   :  { %819 = vsyncpa [#allocation3 + $0x1], 1 }

</bundles_post_ra>
